<compile_context>
chip_gen: v6e
topology: v6e:2x2x1
jax: 0.10.0
libtpu: 0.0.40
codegen_flags: <defaults>
</compile_context>

<pallas_src>
import functools

import jax
import jax.numpy as jnp
from jax.experimental import pallas as pl
from jax.experimental.pallas import tpu as pltpu


def make_hetgnn_kernel(rel_src, rel_dst, num_types):
    """Builds the fused kernel; rel_src/rel_dst are static per-relation node-type ids."""

    def kernel(adj_ref, h0_ref, w_ref, b_ref, o_ref, h_sc):
        # adj_ref: (R, N_pad, N_pad)  bf16  normalized dense adjacency (dst x src)
        # h0_ref : (T, N_pad, D_pad)  bf16  initial node features per node type
        # w_ref  : (R, D_pad, D_pad)  bf16  this layer's GraphConv weights (layer dim squeezed)
        # b_ref  : (T, 1, D_pad)      f32   this layer's biases, pre-summed per dst type
        # o_ref  : (T, N_pad, D_pad)  f32   final-layer output (resident across the grid)
        # h_sc   : (T, N_pad, D_pad)  bf16  VMEM-resident activations between layers
        layer = pl.program_id(0)

        @pl.when(layer == 0)
        def _():
            h_sc[...] = h0_ref[...]

        # Compute all new per-type activations before overwriting h_sc (the new value
        # of one dst type depends on the OLD values of its src types).
        new_h = []
        for t in range(num_types):
            acc = jnp.zeros(o_ref.shape[1:], jnp.float32)
            for r in range(len(rel_src)):
                if rel_dst[r] != t:
                    continue
                # X @ W on the MXU: bf16 inputs, f32 accumulation.
                xw = jnp.dot(h_sc[rel_src[r]], w_ref[r],
                             preferred_element_type=jnp.float32)
                # Ahat @ (X W): cast back to bf16 for the MXU, accumulate in f32.
                acc = acc + jnp.dot(adj_ref[r], xw.astype(adj_ref.dtype),
                                    preferred_element_type=jnp.float32)
            new_h.append(acc + b_ref[t])            # bias added once per dst type

        for t in range(num_types):
            h_sc[t] = new_h[t].astype(h_sc.dtype)   # activations stay in VMEM

        @pl.when(layer == pl.num_programs(0) - 1)
        def _():
            for t in range(num_types):
                o_ref[t] = new_h[t]

    return kernel


def hetgnn_forward(adj_stack, h0, w_stack, b_stack, rel_src, rel_dst):
    """One pallas_call for the whole multi-layer heterogeneous forward pass."""
    num_layers, num_rel, d_pad, _ = w_stack.shape
    num_types, n_pad, _ = h0.shape
    kernel = make_hetgnn_kernel(rel_src, rel_dst, num_types)
    return pl.pallas_call(
        kernel,
        out_shape=jax.ShapeDtypeStruct((num_types, n_pad, d_pad), jnp.float32),
        grid_spec=pltpu.PrefetchScalarGridSpec(
            num_scalar_prefetch=0,
            grid=(num_layers,),   # layers are sequential -> 'arbitrary'
            in_specs=[
                pl.BlockSpec((num_rel, n_pad, n_pad), lambda l: (0, 0, 0)),
                pl.BlockSpec((num_types, n_pad, d_pad), lambda l: (0, 0, 0)),
                pl.BlockSpec((None, num_rel, d_pad, d_pad), lambda l: (l, 0, 0, 0)),
                pl.BlockSpec((None, num_types, 1, d_pad), lambda l: (l, 0, 0, 0)),
            ],
            out_specs=pl.BlockSpec((num_types, n_pad, d_pad), lambda l: (0, 0, 0)),
            scratch_shapes=[pltpu.VMEM((num_types, n_pad, d_pad), jnp.bfloat16)],
        ),
        compiler_params=pltpu.CompilerParams(
            dimension_semantics=("arbitrary",)),
    )(adj_stack, h0, w_stack, b_stack)


def normalized_adj(adj):
    # DGL GraphConv(norm='both'): D_dst^{-1/2} A D_src^{-1/2}.  DGL maps inf->0 for
    # zero degrees; clamping degrees to >=1 is numerically identical here because
    # zero-degree rows/cols of A are all-zero (documented on purpose; don't "fix").
    out_deg = jnp.maximum(adj.sum(axis=0), 1.0)   # src out-degree
    in_deg = jnp.maximum(adj.sum(axis=1), 1.0)    # dst in-degree
    return adj * (in_deg[:, None] ** -0.5) * (out_deg[None, :] ** -0.5)


def pad_to(a, shape):
    out = jnp.zeros(shape, a.dtype)
    return out.at[tuple(slice(0, s) for s in a.shape)].set(a)


if __name__ == "__main__":
    # ---- synthetic heterogeneous graph ------------------------------------
    N_USER, N_ITEM = 12, 10
    IN_DIM, OUT_DIM = 16, 8
    NUM_HIDDEN = 1            # total layers = NUM_HIDDEN + 2 = 3
    N_PAD = 16                # padded node count per type (sublane multiple)
    D_PAD = 128               # lane-dense feature padding (multiple of 128)

    ntypes = ["user", "item"]
    rel_names = ["follows", "buys", "bought_by"]
    rel_src_type = {"follows": "user", "buys": "user", "bought_by": "item"}
    rel_dst_type = {"follows": "user", "buys": "item", "bought_by": "user"}
    rel_src = tuple(ntypes.index(rel_src_type[r]) for r in rel_names)
    rel_dst = tuple(ntypes.index(rel_dst_type[r]) for r in rel_names)
    n_nodes = {"user": N_USER, "item": N_ITEM}

    key = jax.random.PRNGKey(0)
    keys = jax.random.split(key, 32)

    a_uu = (jax.random.uniform(keys[0], (N_USER, N_USER)) < 0.3).astype(jnp.float32)
    a_ui = (jax.random.uniform(keys[1], (N_ITEM, N_USER)) < 0.3).astype(jnp.float32)
    a_iu = (jax.random.uniform(keys[2], (N_USER, N_ITEM)) < 0.3).astype(jnp.float32)
    adj_raw = {"follows": a_uu, "buys": a_ui, "bought_by": a_iu}
    adj_norm = {r: normalized_adj(adj_raw[r]) for r in rel_names}

    x_user = jax.random.normal(keys[3], (N_USER, IN_DIM), jnp.float32)
    x_item = jax.random.normal(keys[4], (N_ITEM, IN_DIM), jnp.float32)

    # ---- parameters (weights random; biases random to exercise the bias path;
    #      DGL's GraphConv initializes biases to zero) ----------------------
    layer_dims = [(IN_DIM, IN_DIM)] * (1 + NUM_HIDDEN) + [(IN_DIM, OUT_DIM)]
    params = []
    kidx = 5
    for din, dout in layer_dims:
        lp = {}
        for rel in rel_names:
            w = jax.random.normal(keys[kidx], (din, dout), jnp.float32) * 0.1
            kidx += 1
            b = jax.random.normal(keys[kidx], (dout,), jnp.float32) * 0.1
            kidx += 1
            lp[rel] = (w, b)
        params.append(lp)
    num_layers = len(params)

    # ---- host-side packing, done ONCE (hoisted out of the forward path) ---
    adj_stack = jnp.stack(
        [pad_to(adj_norm[r], (N_PAD, N_PAD)) for r in rel_names]
    ).astype(jnp.bfloat16)                                      # (R, N_PAD, N_PAD)
    h0 = jnp.stack(
        [pad_to(x_user, (N_PAD, D_PAD)), pad_to(x_item, (N_PAD, D_PAD))]
    ).astype(jnp.bfloat16)                                      # (T, N_PAD, D_PAD)
    w_stack = jnp.stack(
        [jnp.stack([pad_to(params[l][r][0], (D_PAD, D_PAD)) for r in rel_names])
         for l in range(num_layers)]
    ).astype(jnp.bfloat16)                                      # (L, R, D_PAD, D_PAD)
    b_stack = jnp.zeros((num_layers, len(ntypes), 1, D_PAD), jnp.float32)
    for l in range(num_layers):
        for ri, r in enumerate(rel_names):
            b = params[l][r][1]
            b_stack = b_stack.at[l, rel_dst[ri], 0, : b.shape[0]].add(b)  # per-dst pre-sum

    fwd = jax.jit(functools.partial(hetgnn_forward, rel_src=rel_src, rel_dst=rel_dst))

    # ---- Pallas forward (same graph reused as every layer's block;
    #      nn.Dropout(p=0.0) is the identity) -------------------------------
    out_pad = fwd(adj_stack, h0, w_stack, b_stack)
    jax.block_until_ready(out_pad)
    out = {t: out_pad[i, : n_nodes[t], :OUT_DIM] for i, t in enumerate(ntypes)}

    # ---- pure-JAX references -----------------------------------------------
    dst_rels = {"user": [("follows", "user"), ("bought_by", "item")],
                "item": [("buys", "user")]}

    def ref_forward(xu, xi, matmul_dtype):
        c = lambda a: a.astype(matmul_dtype)
        h = {"user": xu, "item": xi}
        for lp in params:
            new_h = {}
            for dst, rels in dst_rels.items():
                acc = None
                for r, s in rels:
                    w, b = lp[r]
                    xw = jnp.dot(c(h[s]), c(w), preferred_element_type=jnp.float32)
                    o = jnp.dot(c(adj_norm[r]), c(xw),
                                preferred_element_type=jnp.float32) + b
                    acc = o if acc is None else acc + o
                new_h[dst] = acc
            h = new_h
        return h

    ref_bf16 = ref_forward(x_user, x_item, jnp.bfloat16)   # same precision as kernel
    ref_f32 = ref_forward(x_user, x_item, jnp.float32)     # full-precision sanity check

    for t in ntypes:
        assert out[t].shape == ref_bf16[t].shape, (t, out[t].shape, ref_bf16[t].shape)
        # exact-path check (bf16 MXU inputs, f32 accumulation, same cast points)
        assert jnp.allclose(out[t], ref_bf16[t], atol=2e-3, rtol=2e-3), t
        # loose sanity vs. full-f32 math (bf16 inputs drop mantissa bits)
        assert jnp.allclose(out[t], ref_f32[t], atol=1e-1, rtol=1e-1), t

    print("KERNEL_OK")
</pallas_src>

<mosaic_0001>
module attributes {stable_mosaic.version = 11 : i64} {
  func.func @kernel(%arg0: i32, %arg1: memref<3x16x16xbf16, #tpu.memory_space<vmem>>, %arg2: memref<2x16x128xbf16, #tpu.memory_space<vmem>>, %arg3: memref<1x3x128x128xbf16, #tpu.memory_space<vmem>>, %arg4: memref<1x2x1x128xf32, #tpu.memory_space<vmem>>, %arg5: memref<2x16x128xf32, #tpu.memory_space<vmem>>, %arg6: memref<2x16x128xbf16, #tpu.memory_space<vmem>>) attributes {dimension_semantics = [#tpu.dimension_semantics<arbitrary>], iteration_bounds = array<i64: 3>, scalar_prefetch = 0 : i64, scratch_operands = 1 : i64, tpu.core_type = #tpu.core_type<tc>, window_params = [{pipeline_mode = #tpu.pipeline_mode<synchronous>, transform_indices = @transform_0, window_bounds = array<i64: 3, 16, 16>}, {pipeline_mode = #tpu.pipeline_mode<synchronous>, transform_indices = @transform_1, window_bounds = array<i64: 2, 16, 128>}, {transform_indices = @transform_2, window_bounds = array<i64: 1, 3, 128, 128>}, {transform_indices = @transform_3, window_bounds = array<i64: 1, 2, 1, 128>}, {pipeline_mode = #tpu.pipeline_mode<synchronous>, transform_indices = @transform_4, window_bounds = array<i64: 2, 16, 128>}]} {
    %c0_i32 = arith.constant 0 : i32
    %0 = arith.cmpi eq, %arg0, %c0_i32 : i32
    %1 = arith.extui %0 : i1 to i32
    %c0_i32_0 = arith.constant 0 : i32
    %2 = arith.cmpi ne, %1, %c0_i32_0 : i32
    scf.if %2 {
      %c0_50 = arith.constant 0 : index
      %c0_51 = arith.constant 0 : index
      %c0_52 = arith.constant 0 : index
      %54 = vector.load %arg2[%c0_50, %c0_51, %c0_52] : memref<2x16x128xbf16, #tpu.memory_space<vmem>>, vector<2x16x128xbf16>
      %c0_53 = arith.constant 0 : index
      %c0_54 = arith.constant 0 : index
      %c0_55 = arith.constant 0 : index
      %55 = vector.load %arg6[%c0_53, %c0_54, %c0_55] : memref<2x16x128xbf16, #tpu.memory_space<vmem>>, vector<2x16x128xbf16>
      tpu.vector_store %arg6[%c0_53, %c0_54, %c0_55], %54 {strides = array<i32>} : memref<2x16x128xbf16, #tpu.memory_space<vmem>>, vector<2x16x128xbf16>,
    } else {
    }
    %cst = arith.constant 0.000000e+00 : f32
    %3 = vector.broadcast %cst : f32 to vector<16x128xf32>
    %c0 = arith.constant 0 : index
    %c0_1 = arith.constant 0 : index
    %c0_2 = arith.constant 0 : index
    %4 = vector.load %arg6[%c0, %c0_1, %c0_2] : memref<2x16x128xbf16, #tpu.memory_space<vmem>>, vector<1x16x128xbf16>
    %5 = vector.shape_cast %4 : vector<1x16x128xbf16> to vector<16x128xbf16>
    %c0_3 = arith.constant 0 : index
    %c0_4 = arith.constant 0 : index
    %c0_5 = arith.constant 0 : index
    %c0_6 = arith.constant 0 : index
    %6 = vector.load %arg3[%c0_3, %c0_4, %c0_5, %c0_6] : memref<1x3x128x128xbf16, #tpu.memory_space<vmem>>, vector<1x1x128x128xbf16>
    %7 = vector.shape_cast %6 : vector<1x1x128x128xbf16> to vector<128x128xbf16>
    %cst_7 = arith.constant dense<0.000000e+00> : vector<16x128xf32>
    %8 = tpu.matmul %5, %7, %cst_7 {dimension_numbers = #tpu.dot_dimension_numbers<[1], [0], [0], [1], [0, 0, 1, 1], [], []>} : vector<16x128xbf16>, vector<128x128xbf16>, vector<16x128xf32> -> vector<16x128xf32>
    %c0_8 = arith.constant 0 : index
    %c0_9 = arith.constant 0 : index
    %c0_10 = arith.constant 0 : index
    %9 = vector.load %arg1[%c0_8, %c0_9, %c0_10] : memref<3x16x16xbf16, #tpu.memory_space<vmem>>, vector<1x16x16xbf16>
    %10 = vector.shape_cast %9 : vector<1x16x16xbf16> to vector<16x16xbf16>
    %11 = arith.truncf %8 : vector<16x128xf32> to vector<16x128xbf16>
    %cst_11 = arith.constant dense<0.000000e+00> : vector<16x128xf32>
    %12 = tpu.matmul %10, %11, %cst_11 {dimension_numbers = #tpu.dot_dimension_numbers<[1], [0], [0], [1], [0, 0, 1, 1], [], []>} : vector<16x16xbf16>, vector<16x128xbf16>, vector<16x128xf32> -> vector<16x128xf32>
    %13 = arith.addf %3, %12 : vector<16x128xf32>
    %c1 = arith.constant 1 : index
    %c0_12 = arith.constant 0 : index
    %c0_13 = arith.constant 0 : index
    %14 = vector.load %arg6[%c1, %c0_12, %c0_13] : memref<2x16x128xbf16, #tpu.memory_space<vmem>>, vector<1x16x128xbf16>
    %15 = vector.shape_cast %14 : vector<1x16x128xbf16> to vector<16x128xbf16>
    %c0_14 = arith.constant 0 : index
    %c2 = arith.constant 2 : index
    %c0_15 = arith.constant 0 : index
    %c0_16 = arith.constant 0 : index
    %16 = vector.load %arg3[%c0_14, %c2, %c0_15, %c0_16] : memref<1x3x128x128xbf16, #tpu.memory_space<vmem>>, vector<1x1x128x128xbf16>
    %17 = vector.shape_cast %16 : vector<1x1x128x128xbf16> to vector<128x128xbf16>
    %cst_17 = arith.constant dense<0.000000e+00> : vector<16x128xf32>
    %18 = tpu.matmul %15, %17, %cst_17 {dimension_numbers = #tpu.dot_dimension_numbers<[1], [0], [0], [1], [0, 0, 1, 1], [], []>} : vector<16x128xbf16>, vector<128x128xbf16>, vector<16x128xf32> -> vector<16x128xf32>
    %c2_18 = arith.constant 2 : index
    %c0_19 = arith.constant 0 : index
    %c0_20 = arith.constant 0 : index
    %19 = vector.load %arg1[%c2_18, %c0_19, %c0_20] : memref<3x16x16xbf16, #tpu.memory_space<vmem>>, vector<1x16x16xbf16>
    %20 = vector.shape_cast %19 : vector<1x16x16xbf16> to vector<16x16xbf16>
    %21 = arith.truncf %18 : vector<16x128xf32> to vector<16x128xbf16>
    %cst_21 = arith.constant dense<0.000000e+00> : vector<16x128xf32>
    %22 = tpu.matmul %20, %21, %cst_21 {dimension_numbers = #tpu.dot_dimension_numbers<[1], [0], [0], [1], [0, 0, 1, 1], [], []>} : vector<16x16xbf16>, vector<16x128xbf16>, vector<16x128xf32> -> vector<16x128xf32>
    %23 = arith.addf %13, %22 : vector<16x128xf32>
    %c0_22 = arith.constant 0 : index
    %c0_23 = arith.constant 0 : index
    %c0_24 = arith.constant 0 : index
    %c0_25 = arith.constant 0 : index
    %24 = vector.load %arg4[%c0_22, %c0_23, %c0_24, %c0_25] : memref<1x2x1x128xf32, #tpu.memory_space<vmem>>, vector<1x1x1x128xf32>
    %25 = vector.shape_cast %24 : vector<1x1x1x128xf32> to vector<1x128xf32>
    %26 = vector.broadcast %25 : vector<1x128xf32> to vector<16x128xf32>
    %27 = arith.addf %23, %26 : vector<16x128xf32>
    %cst_26 = arith.constant 0.000000e+00 : f32
    %28 = vector.broadcast %cst_26 : f32 to vector<16x128xf32>
    %c0_27 = arith.constant 0 : index
    %c0_28 = arith.constant 0 : index
    %c0_29 = arith.constant 0 : index
    %29 = vector.load %arg6[%c0_27, %c0_28, %c0_29] : memref<2x16x128xbf16, #tpu.memory_space<vmem>>, vector<1x16x128xbf16>
    %30 = vector.shape_cast %29 : vector<1x16x128xbf16> to vector<16x128xbf16>
    %c0_30 = arith.constant 0 : index
    %c1_31 = arith.constant 1 : index
    %c0_32 = arith.constant 0 : index
    %c0_33 = arith.constant 0 : index
    %31 = vector.load %arg3[%c0_30, %c1_31, %c0_32, %c0_33] : memref<1x3x128x128xbf16, #tpu.memory_space<vmem>>, vector<1x1x128x128xbf16>
    %32 = vector.shape_cast %31 : vector<1x1x128x128xbf16> to vector<128x128xbf16>
    %cst_34 = arith.constant dense<0.000000e+00> : vector<16x128xf32>
    %33 = tpu.matmul %30, %32, %cst_34 {dimension_numbers = #tpu.dot_dimension_numbers<[1], [0], [0], [1], [0, 0, 1, 1], [], []>} : vector<16x128xbf16>, vector<128x128xbf16>, vector<16x128xf32> -> vector<16x128xf32>
    %c1_35 = arith.constant 1 : index
    %c0_36 = arith.constant 0 : index
    %c0_37 = arith.constant 0 : index
    %34 = vector.load %arg1[%c1_35, %c0_36, %c0_37] : memref<3x16x16xbf16, #tpu.memory_space<vmem>>, vector<1x16x16xbf16>
    %35 = vector.shape_cast %34 : vector<1x16x16xbf16> to vector<16x16xbf16>
    %36 = arith.truncf %33 : vector<16x128xf32> to vector<16x128xbf16>
    %cst_38 = arith.constant dense<0.000000e+00> : vector<16x128xf32>
    %37 = tpu.matmul %35, %36, %cst_38 {dimension_numbers = #tpu.dot_dimension_numbers<[1], [0], [0], [1], [0, 0, 1, 1], [], []>} : vector<16x16xbf16>, vector<16x128xbf16>, vector<16x128xf32> -> vector<16x128xf32>
    %38 = arith.addf %28, %37 : vector<16x128xf32>
    %c0_39 = arith.constant 0 : index
    %c1_40 = arith.constant 1 : index
    %c0_41 = arith.constant 0 : index
    %c0_42 = arith.constant 0 : index
    %39 = vector.load %arg4[%c0_39, %c1_40, %c0_41, %c0_42] : memref<1x2x1x128xf32, #tpu.memory_space<vmem>>, vector<1x1x1x128xf32>
    %40 = vector.shape_cast %39 : vector<1x1x1x128xf32> to vector<1x128xf32>
    %41 = vector.broadcast %40 : vector<1x128xf32> to vector<16x128xf32>
    %42 = arith.addf %38, %41 : vector<16x128xf32>
    %43 = arith.truncf %27 : vector<16x128xf32> to vector<16x128xbf16>
    %c0_43 = arith.constant 0 : index
    %c0_44 = arith.constant 0 : index
    %c0_45 = arith.constant 0 : index
    %44 = vector.load %arg6[%c0_43, %c0_44, %c0_45] : memref<2x16x128xbf16, #tpu.memory_space<vmem>>, vector<1x16x128xbf16>
    %45 = vector.shape_cast %44 : vector<1x16x128xbf16> to vector<16x128xbf16>
    %46 = vector.shape_cast %43 : vector<16x128xbf16> to vector<1x16x128xbf16>
    tpu.vector_store %arg6[%c0_43, %c0_44, %c0_45], %46 {strides = array<i32>} : memref<2x16x128xbf16, #tpu.memory_space<vmem>>, vector<1x16x128xbf16>,
    %47 = arith.truncf %42 : vector<16x128xf32> to vector<16x128xbf16>
    %c1_46 = arith.constant 1 : index
    %c0_47 = arith.constant 0 : index
    %c0_48 = arith.constant 0 : index
    %48 = vector.load %arg6[%c1_46, %c0_47, %c0_48] : memref<2x16x128xbf16, #tpu.memory_space<vmem>>, vector<1x16x128xbf16>
    %49 = vector.shape_cast %48 : vector<1x16x128xbf16> to vector<16x128xbf16>
    %50 = vector.shape_cast %47 : vector<16x128xbf16> to vector<1x16x128xbf16>
    tpu.vector_store %arg6[%c1_46, %c0_47, %c0_48], %50 {strides = array<i32>} : memref<2x16x128xbf16, #tpu.memory_space<vmem>>, vector<1x16x128xbf16>,
    %c2_i32 = arith.constant 2 : i32
    %51 = arith.cmpi eq, %arg0, %c2_i32 : i32
    %52 = arith.extui %51 : i1 to i32
    %c0_i32_49 = arith.constant 0 : i32
    %53 = arith.cmpi ne, %52, %c0_i32_49 : i32
    scf.if %53 {
      %c0_50 = arith.constant 0 : index
      %c0_51 = arith.constant 0 : index
      %c0_52 = arith.constant 0 : index
      %54 = vector.load %arg5[%c0_50, %c0_51, %c0_52] : memref<2x16x128xf32, #tpu.memory_space<vmem>>, vector<1x16x128xf32>
      %55 = vector.shape_cast %54 : vector<1x16x128xf32> to vector<16x128xf32>
      %56 = vector.shape_cast %27 : vector<16x128xf32> to vector<1x16x128xf32>
      tpu.vector_store %arg5[%c0_50, %c0_51, %c0_52], %56 {strides = array<i32>} : memref<2x16x128xf32, #tpu.memory_space<vmem>>, vector<1x16x128xf32>,
      %c1_53 = arith.constant 1 : index
      %c0_54 = arith.constant 0 : index
      %c0_55 = arith.constant 0 : index
      %57 = vector.load %arg5[%c1_53, %c0_54, %c0_55] : memref<2x16x128xf32, #tpu.memory_space<vmem>>, vector<1x16x128xf32>
      %58 = vector.shape_cast %57 : vector<1x16x128xf32> to vector<16x128xf32>
      %59 = vector.shape_cast %42 : vector<16x128xf32> to vector<1x16x128xf32>
      tpu.vector_store %arg5[%c1_53, %c0_54, %c0_55], %59 {strides = array<i32>} : memref<2x16x128xf32, #tpu.memory_space<vmem>>, vector<1x16x128xf32>,
    } else {
    }
    return
  }
  func.func @transform_0(%arg0: i32) -> (i32, i32, i32) {
    %c0_i32 = arith.constant 0 : i32
    %c0_i32_0 = arith.constant 0 : i32
    %c0_i32_1 = arith.constant 0 : i32
    %c0_i32_2 = arith.constant 0 : i32
    return %c0_i32, %c0_i32_0, %c0_i32_1 : i32, i32, i32
  }
  func.func @transform_1(%arg0: i32) -> (i32, i32, i32) {
    %c0_i32 = arith.constant 0 : i32
    %c0_i32_0 = arith.constant 0 : i32
    %c0_i32_1 = arith.constant 0 : i32
    %c0_i32_2 = arith.constant 0 : i32
    return %c0_i32, %c0_i32_0, %c0_i32_1 : i32, i32, i32
  }
  func.func @transform_2(%arg0: i32) -> (i32, i32, i32, i32) {
    %c0_i32 = arith.constant 0 : i32
    %c0_i32_0 = arith.constant 0 : i32
    %c0_i32_1 = arith.constant 0 : i32
    %c0_i32_2 = arith.constant 0 : i32
    return %arg0, %c0_i32, %c0_i32_0, %c0_i32_1 : i32, i32, i32, i32
  }
  func.func @transform_3(%arg0: i32) -> (i32, i32, i32, i32) {
    %c0_i32 = arith.constant 0 : i32
    %c0_i32_0 = arith.constant 0 : i32
    %c0_i32_1 = arith.constant 0 : i32
    %c0_i32_2 = arith.constant 0 : i32
    return %arg0, %c0_i32, %c0_i32_0, %c0_i32_1 : i32, i32, i32, i32
  }
  func.func @transform_4(%arg0: i32) -> (i32, i32, i32) {
    %c0_i32 = arith.constant 0 : i32
    %c0_i32_0 = arith.constant 0 : i32
    %c0_i32_1 = arith.constant 0 : i32
    %c0_i32_2 = arith.constant 0 : i32
    return %c0_i32, %c0_i32_0, %c0_i32_1 : i32, i32, i32
  }
}

</mosaic_0001>

<bundles_post_ra>
// kernel: hetgnn_forward.1
= control target key start
LH: loop header
LB: loop body
LE: loop exit
PB: predicated region body
PF: predicated region fallthrough
CT: control target
= control target key end

     0   :  { %9 = vsyncpa [#allocation4], 0  ;;  %s1755_s0 = inlined_call_operand.hbm [shape: bf16[3,16,16], index: 0, kind: input, shape index: {}]   ;;  %s1756_s1 = inlined_call_operand.hbm [shape: bf16[2,16,128], index: 1, kind: input, shape index: {}]   ;;  %s1757_s2 = inlined_call_operand.hbm [shape: bf16[3,3,128,128], index: 2, kind: input, shape index: {}]   ;;  %s1758_s3 = inlined_call_operand.hbm [shape: f32[3,2,1,128], index: 3, kind: input, shape index: {}]   ;;  %s1759_s4 = inlined_call_operand.hbm [shape: f32[2,16,128], index: 4, kind: output, shape index: {}]  }
   0x1   :  { %10 = vsyncpa [#allocation7], 0 }
   0x2   :  { %11 = vsyncpa [#allocation5], 0  ;;  %s1464_s15 = smov 0   ;;  %s1466_s16 = smov 0  }
   0x3   :  { %s1468_s17 = smov 0   ;;  %s1470_s18 = smov 0  }
   0x4 LB: > { %s1483_s19 = sadd.s32 4294967295, %s1424_s18   ;;  %s1486_s20 = sadd.s32 1, %s1424_s18   ;;  %s1424_s18 = sphi %s1470_s18, %s1780_s18   ;;  %s1420_s17 = sphi %s1468_s17, %s1779_s17   ;;  %s1416_s16 = sphi %s1466_s16, %s1778_s16   ;;  %s1412_s15 = sphi %s1464_s15, %s1777_s15  }
   0x5   : > { %s63_s21 = ssub.s32 %s1424_s18, %s1486_s20  ;;  %s66_s22 = sadd.s32 1, %s1420_s17 }
   0x6   : > { %p64_p0 = scmp.eq.s32.totalorder %s63_s21, 0  ;;  %p73_p1 = scmp.ne.s32.totalorder %s1420_s17, %s1416_s16 }
   0x7   : > { %p74_p2 = scmp.eq.s32.totalorder %s1424_s18, 0  ;;  %p79_p3 = scmp.ne.s32.totalorder %s1416_s16, %s1412_s15 }
   0x8   : > { %s1496_s23 = scalar_select %p64_p0, %s1420_s17, %s66_s22  }
   0x9   : > { %p1498_p4 = por %p74_p2, %p73_p1  ;;  %p1760_p5 = scmp.eq.s32.totalorder %s1483_s19, 0 }
   0xa   : > { %p919_p6 = scmp.ge.s32.totalorder %s1424_s18, 1  ;;  %p137_p7 = scmp.lt.s32.totalorder %s1424_s18, 4 }
   0xb   : > { %p1507_p8 = por %p1760_p5, %p79_p3  ;;  %s1426_s27 = smov [#allocation3]  }
   0xc   : > { %p1512_p10 = pnand %p919_p6, %p137_p7  ;;  %s149_s28 = sshll.u32 %s1426_s27, 4  ;;  %s150_s28 = int_to_ptr.vmem [resolvable:$true] %s149_s28 }
   0xd   : > { %s1765_s25 = scalar_select %p1507_p8, 1, 0 }
   0xe   : > { %s1766_s26 = scalar_select %p1512_p10, 1, 0 }
   0xf   : > { %p1153_p11 = pneg %p1512_p10  ;;  %p1169_p13 = scmp.lt.s32.totalorder %s1424_s18, 3 }
  0x10   : > { %s176_s30 = sand.u32 1, %s1424_s18   ;;  %s178_s5 = sand.u32 1, %s1420_s17  }
  0x11   : > { %p1520_p12 = pnand %p1153_p11, %p1760_p5  ;;  %p1529_p0 = pnand %p1169_p13, %p1498_p4 }
  0x12   : > { %s1257_s7 = scalar_lea.vmem %s150_s28, 384  ;;  %p1265_p7 = scmp.lt.s32.totalorder %s150_s28, %s150_s28 }
  0x13   : > { %p1761_p1 = pneg %p1520_p12  ;;  %p1258_p2 = scmp.ne.s32.totalorder %s150_s28, %s1257_s7 }
  0x14   : > { %p1266_p11 = scmp.lt.s32.totalorder %s1257_s7, %s1257_s7 }
  0x15   : > { %p1260_p3 = pnand %p1258_p2, %p1761_p1 }
  0x16   : > { %p1267_p9 = por %p1266_p11, %p1265_p7 }
  0x17   : > { %p1261_p6 = pneg %p1260_p3 }
  0x19   : > { %p1268_p5 = pnand %p1267_p9, %p1261_p6 }
  0x1b   : > { %1271 = shalt.err (!%p1268_p5)
}
  0x1c   : > { %s1427_s8 = smov 64   ;;  %s1428_s9 = smov 4  }
  0x1d   : > { %1156 = dma.hbm_to_vmem [thread:$0]  (!%p1520_p12), %s1755_s0, 384, %s150_s28, [#allocation4], %s1427_s8, %s1427_s8, %s1428_s9  }
  0x1e   : > { %s1134_s12 = smul.u32 192, %s178_s5  ;;  %s1429_s14 = smov [#allocation6]  }
  0x1f   : > { %s1135_s13 = smul.u32 3072, %s1424_s18  ;;  %s162_s15 = sshll.u32 %s1429_s14, 4  ;;  %s1547_s15 = int_to_ptr.vmem [resolvable:$true] %s162_s15 }
  0x20   : > { %s180_s27 = scalar_lea.vmem [#allocation8], %s1134_s12  ;;  %s1556_s10 = sshll.u32 %s178_s5, 1 }
  0x21   : > { %s1552_s24 = scalar_lea.hbm %s1757_s2, %s1135_s13  ;;  %s187_s7 = sshll.u32 %s180_s27, 4  ;;  %s1554_s7 = int_to_ptr.vmem [resolvable:$true] %s187_s7 }
  0x22   : > { %s1558_s28 = scalar_lea.sflag [#allocation4], %s176_s30  ;;  %s1272_s11 = scalar_lea.hbm %s1552_s24, 3072 }
  0x23   : > { %p1273_p4 = scmp.ne.s32.totalorder %s1552_s24, %s1272_s11  ;;  %p1274_p5 = pneg %p1529_p0 }
  0x24   : > { %s1277_s21 = scalar_lea.hbm %s1757_s2, 9216  ;;  %p1278_p2 = scmp.lt.s32.totalorder %s1552_s24, %s1757_s2 }
  0x25   : > { %p1275_p9 = pnand %p1274_p5, %p1273_p4  ;;  %p1279_p3 = scmp.lt.s32.totalorder %s1277_s21, %s1272_s11 }
  0x27   : > { %p1276_p13 = pneg %p1275_p9  ;;  %p1280_p6 = por %p1279_p3, %p1278_p2 }
  0x29   : > { %p1281_p7 = pnand %p1280_p6, %p1276_p13 }
  0x2b   : > { %1284 = shalt.err (!%p1281_p7)
}
  0x2c   : > { %s1285_s30 = scalar_lea.vmem %s1554_s7, 3072  ;;  %s1430_s5 = smov [#allocation8]  }
  0x2d   : > { %p1286_p11 = scmp.ne.s32.totalorder %s1554_s7, %s1285_s30  ;;  %s1290_s27 = sshll.u32 %s1430_s5, 4  ;;  %s1291_s27 = int_to_ptr.vmem [resolvable:$false] %s1290_s27 }
  0x2e   : > { %s1292_s13 = scalar_lea.vmem %s1291_s27, 6144  ;;  %p1293_p1 = scmp.lt.s32.totalorder %s1554_s7, %s1291_s27 }
  0x2f   : > { %p1288_p4 = pnand %p1286_p11, %p1274_p5  ;;  %p1294_p8 = scmp.lt.s32.totalorder %s1292_s13, %s1285_s30 }
  0x31   : > { %p1289_p9 = pneg %p1288_p4  ;;  %p1295_p10 = por %p1294_p8, %p1293_p1 }
  0x33   : > { %p1296_p2 = pnand %p1295_p10, %p1289_p9 }
  0x35   : > { %1299 = shalt.err (!%p1296_p2)
}
  0x36   : > { %1163 = dma.hbm_to_vmem [thread:$0]  (!%p1529_p0), %s1552_s24, 3072, %s1554_s7, %s1558_s28, %s1427_s8, %s1427_s8, %s1428_s9  }
  0x37   : > { %s1311_s11 = scalar_lea.vmem %s1547_s15, 256  ;;  %p1769_p3 = pneg %p1520_p12 }
  0x38   : > { %p1312_p13 = scmp.ne.s32.totalorder %s1547_s15, %s1311_s11  ;;  %p1319_p1 = scmp.lt.s32.totalorder %s1547_s15, %s1547_s15 }
  0x39   : > { %p1320_p6 = scmp.lt.s32.totalorder %s1311_s11, %s1311_s11 }
  0x3a   : > { %p1314_p8 = pnand %p1312_p13, %p1769_p3 }
  0x3b   : > { %p1321_p7 = por %p1320_p6, %p1319_p1 }
  0x3c   : > { %p1315_p10 = pneg %p1314_p8 }
  0x3e   : > { %p1322_p11 = pnand %p1321_p7, %p1315_p10 }
  0x40   : > { %1325 = shalt.err (!%p1322_p11)
}
  0x41   : > { %1159 = dma.hbm_to_vmem [thread:$0]  (!%p1520_p12), %s1756_s1, 256, %s1547_s15, [#allocation7], %s1427_s8, %s1427_s8, %s1428_s9  }
  0x42   : > { %s1008_s7 = sshll.u32 %s1424_s18, 5  ;;  %s201_s29 = scalar_lea.vmem [#allocation9], %s1556_s10 }
  0x43   : > { %s1608_s22 = scalar_lea.hbm %s1758_s3, %s1008_s7  ;;  %s208_s30 = sshll.u32 %s201_s29, 4  ;;  %s1611_s30 = int_to_ptr.vmem [resolvable:$true] %s208_s30 }
  0x44   : > { %s1326_s5 = scalar_lea.hbm %s1608_s22, 32  ;;  %s1331_s9 = scalar_lea.hbm %s1758_s3, 96 }
  0x45   : > { %p1327_p4 = scmp.ne.s32.totalorder %s1608_s22, %s1326_s5  ;;  %p1332_p12 = scmp.lt.s32.totalorder %s1608_s22, %s1758_s3 }
  0x46   : > { %p1333_p13 = scmp.lt.s32.totalorder %s1331_s9, %s1326_s5 }
  0x47   : > { %p1329_p9 = pnand %p1327_p4, %p1274_p5 }
  0x48   : > { %p1334_p3 = por %p1333_p13, %p1332_p12 }
  0x49   : > { %p1330_p2 = pneg %p1329_p9 }
  0x4b   : > { %p1335_p8 = pnand %p1334_p3, %p1330_p2 }
  0x4d   : > { %1338 = shalt.err (!%p1335_p8)
}
  0x4e   : > { %s1339_s10 = scalar_lea.vmem %s1611_s30, 32  ;;  %s1431_s13 = smov [#allocation9]  }
  0x4f   : > { %p1340_p10 = scmp.ne.s32.totalorder %s1611_s30, %s1339_s10  ;;  %s1344_s11 = sshll.u32 %s1431_s13, 4  ;;  %s1345_s11 = int_to_ptr.vmem [resolvable:$false] %s1344_s11 }
  0x50   : > { %s1346_s14 = scalar_lea.vmem %s1345_s11, 64  ;;  %p1347_p7 = scmp.lt.s32.totalorder %s1611_s30, %s1345_s11 }
  0x51   : > { %p1342_p1 = pnand %p1340_p10, %p1274_p5  ;;  %p1348_p11 = scmp.lt.s32.totalorder %s1346_s14, %s1339_s10 }
  0x53   : > { %p1343_p6 = pneg %p1342_p1  ;;  %p1349_p4 = por %p1348_p11, %p1347_p7 }
  0x55   : > { %p1350_p9 = pnand %p1349_p4, %p1343_p6 }
  0x57   : > { %1353 = shalt.err (!%p1350_p9)
}
  0x58   : > { %s1432_s24 = smov 16   ;;  %s1433_s7 = smov 1  }
  0x59   : > { %1166 = dma.hbm_to_vmem [thread:$0]  (!%p1529_p0), %s1608_s22, 32, %s1611_s30, %s1558_s28, %s1432_s24, %s1432_s24, %s1433_s7  }
  0x5a   : > { %p1770_p5 = scmp.ne.s32.totalorder %s1766_s26, 0 }
  0x5b   : > { %p1771_p2 = scmp.eq.s32.totalorder (!%p1770_p5), %s1483_s19, 0 }
  0x5c   : > { %220 = sbr.rel (%p1770_p5) target bundleno = 602 (0x25a), region = 36 }
  0x61   : > { %1395 = dma.done.wait (%p1771_p2), [#allocation4], 384   ;;  %p1772_p12 = pmov %p1771_p2 }
  0x62   : > { %p1773_p13 = pmov %p1771_p2 }
  0x63   : > { %1397 = vsyncadd (%p1772_p12), [#allocation4], 4294966912 }
  0x64   : > { %1399 = dma.done.wait (%p1773_p13), [#allocation7], 256   ;;  %p1774_p3 = pmov %p1771_p2 }
  0x65   : > { %s230_s6 = sand.u32 1, %s1483_s19   ;;  %s232_s28 = sand.u32 1, %s1416_s16  }
  0x66   : > { %1401 = vsyncadd (%p1774_p3), [#allocation7], 4294967040  ;;  %s1136_s21 = smul.u32 192, %s232_s28  ;;  %s231_s26 = scalar_lea.sflag [#allocation4], %s230_s6 }
  0x67   : > { %p1775_p0 = scmp.ne.s32.totalorder %s1765_s25, 0 }
  0x68   : > { %s1648_s12 = scalar_lea.vmem [#allocation8], %s1136_s21 }
  0x69   : > { %1403 = dma.done.wait (%p1775_p0), %s231_s26, 3104  }
  0x6a   : > { %1405 = vsyncadd (%p1775_p0), %s231_s26, 4294964192  ;;  %s1654_s22 = sshll.u32 %s232_s28, 1  ;;  %p1776_p8 = scmp.ne.s32.totalorder %s1483_s19, 0 }
  0x6b   : > { %s243_s29 = scalar_lea.vmem [#allocation9], %s1654_s22 }
  0x6c   : > { %272 = sbr.rel (%p1776_p8) target bundleno = 115 (0x73), region = 56 }
  0x71   : > { %v273_v0 = vld [vmem:[#allocation6] sm:$0xff]   ;;  %v275_v1 = vld [vmem:[#allocation6 + $0x8] sm:$0xff]  }
  0x72   : > { %277 = vst [vmem:[#allocation2] sm:$0xff] %v273_v0   ;;  %279 = vst [vmem:[#allocation2 + $0x8] sm:$0xff] %v275_v1  }
  0x73 PF: > { %v1217_v2 = vld [vmem:[%s1648_s12 + $0x38] sm:$0xff]   ;;  %v1434_v3 = vmov 0.0   ;;  %v1219_v5 = vld [vmem:[%s1648_s12 + $0x30] sm:$0xff]   ;;  %vm1435_vm0 = vmmov 0   ;;  %v1221_v7 = vld [vmem:[%s1648_s12 + $0x28] sm:$0xff]   ;;  %vm521_vm1 = vcmask 130048  }
  0x74   : > { %1056 = vmatprep.subr.bf16.mxu0 %v1434_v3  ;;  %1076 = vmatprep.subr.bf16.mxu1 %v1434_v3  ;;  %v1218_v4 = vld [vmem:[%s1648_s12 + $0xb8] sm:$0xff]   ;;  %v1220_v6 = vld [vmem:[%s1648_s12 + $0xb0] sm:$0xff]   ;;  %v1222_v8 = vld [vmem:[%s1648_s12 + $0xa8] sm:$0xff]   ;;  %p1003_p10 = scmp.ne.s32.totalorder %s1483_s19, 2 }
  0x75   : > { %1057 = vmatpush3.bf16.msra.mxu0 %v1217_v2  ;;  %1072 = vmatprep.mubr.msk.bf16.mxu0 %vm1435_vm0, %v1434_v3  ;;  %v1223_v9 = vld [vmem:[%s1648_s12 + $0x20] sm:$0xff]   ;;  %v1225_v11 = vld [vmem:[%s1648_s12 + $0x18] sm:$0xff]   ;;  %v1227_v13 = vld [vmem:[%s1648_s12 + $0x10] sm:$0xff]  }
  0x76   : > { %1077 = vmatpush3.bf16.msra.mxu1 %v1218_v4  ;;  %1058 = vmatprep.subr.bf16.mxu0 %v1434_v3  ;;  %v1224_v10 = vld [vmem:[%s1648_s12 + $0xa0] sm:$0xff]   ;;  %v1226_v12 = vld [vmem:[%s1648_s12 + $0x98] sm:$0xff]   ;;  %v1228_v14 = vld [vmem:[%s1648_s12 + $0x90] sm:$0xff]  }
  0x77   : > { %1078 = vmatprep.subr.bf16.mxu1 %v1434_v3  ;;  %1092 = vmatprep.mubr.msk.bf16.mxu1 %vm1435_vm0, %v1434_v3  ;;  %v1229_v15 = vld [vmem:[%s1648_s12 + $0x8] sm:$0xff]   ;;  %v1231_v17 = vld [vmem:[%s1648_s12] sm:$0xff]   ;;  %v1235_v21 = vld [vmem:[%s1648_s12 + $0x78] sm:$0xff]  }
  0x78   : > { %v1230_v16 = vld [vmem:[%s1648_s12 + $0x88] sm:$0xff]   ;;  %v1232_v18 = vld [vmem:[%s1648_s12 + $0x80] sm:$0xff]   ;;  %v1236_v22 = vld [vmem:[%s1648_s12 + $0x70] sm:$0xff]  }
  0x79   : > { %1059 = vmatpush3.bf16.msra.mxu0 %v1219_v5  ;;  %v1233_v19 = vld [vmem:[#allocation2] sm:$0xff]   ;;  %v1234_v20 = vld [vmem:[#allocation2 + $0x8] sm:$0xff]   ;;  %v1238_v24 = vld [vmem:[%s1648_s12 + $0x60] sm:$0xff]  }
  0x7a   : > { %1079 = vmatpush3.bf16.msra.mxu1 %v1220_v6  ;;  %1060 = vmatprep.subr.bf16.mxu0 %v1434_v3  ;;  %v1237_v23 = vld [vmem:[%s1648_s12 + $0x68] sm:$0xff]   ;;  %v1239_v25 = vld [vmem:[%s1648_s12 + $0x58] sm:$0xff]   ;;  %v1240_v26 = vld [vmem:[%s1648_s12 + $0x50] sm:$0xff]  }
  0x7b   : > { %1080 = vmatprep.subr.bf16.mxu1 %v1434_v3  ;;  %v1241_v27 = vld [vmem:[%s1648_s12 + $0x48] sm:$0xff]   ;;  %v1242_v28 = vld [vmem:[%s1648_s12 + $0x40] sm:$0xff]   ;;  %v1244_v40 = vld [vmem:[#allocation3] sm:$0xff]  }
  0x7c   : > { %v1243_v37 = vld [vmem:[#allocation3 + $0x10] sm:$0xff]   ;;  %v1245_v46 = vld [vmem:[#allocation3 + $0x8] sm:$0xff]  }
  0x7d   : > { %1061 = vmatpush3.bf16.msra.mxu0 %v1221_v7  ;;  %v970_v53 = vld [vmem:[%s243_s29] ss:$0 sm:$0xff]  ;;  %v996_v62 = vld [vmem:[%s243_s29 + $0x1] ss:$0 sm:$0xff] }
  0x7e   : > { %1081 = vmatpush3.bf16.msra.mxu1 %v1222_v8  ;;  %1062 = vmatprep.subr.bf16.mxu0 %v1434_v3 }
  0x7f   : > { %1082 = vmatprep.subr.bf16.mxu1 %v1434_v3 }
  0x81   : > { %1063 = vmatpush3.bf16.msra.mxu0 %v1223_v9 }
  0x82   : > { %1083 = vmatpush3.bf16.msra.mxu1 %v1224_v10  ;;  %1064 = vmatprep.subr.bf16.mxu0 %v1434_v3 }
  0x83   : > { %1084 = vmatprep.subr.bf16.mxu1 %v1434_v3 }
  0x85   : > { %1065 = vmatpush3.bf16.msra.mxu0 %v1225_v11 }
  0x86   : > { %1085 = vmatpush3.bf16.msra.mxu1 %v1226_v12  ;;  %1066 = vmatprep.subr.bf16.mxu0 %v1434_v3 }
  0x87   : > { %1086 = vmatprep.subr.bf16.mxu1 %v1434_v3 }
  0x89   : > { %1067 = vmatpush3.bf16.msra.mxu0 %v1227_v13 }
  0x8a   : > { %1087 = vmatpush3.bf16.msra.mxu1 %v1228_v14  ;;  %1068 = vmatprep.subr.bf16.mxu0 %v1434_v3 }
  0x8b   : > { %1088 = vmatprep.subr.bf16.mxu1 %v1434_v3 }
  0x8d   : > { %1069 = vmatpush3.bf16.msra.mxu0 %v1229_v15 }
  0x8e   : > { %1089 = vmatpush3.bf16.msra.mxu1 %v1230_v16  ;;  %1070 = vmatprep.subr.bf16.mxu0 %v1434_v3 }
  0x8f   : > { %1090 = vmatprep.subr.bf16.mxu1 %v1434_v3 }
  0x91   : > { %1071 = vmatpush3.bf16.msra.mxu0 %v1231_v17 }
  0x92   : > { %1091 = vmatpush3.bf16.msra.mxu1 %v1232_v18  ;;  %1108 = vmatprep.subr.bf16.mxu0 %v1434_v3 }
  0x93   : > { %1096 = vmatprep.subr.bf16.mxu1 %v1434_v3 }
  0x94   : > { %1073 = vmatmul.mubr.bf16.vlgmr.msra.gmra.mxu0 %v1233_v19 }
  0x95   : > { %1093 = vmatmul.mubr.bf16.vlgmr.msra.gmra.mxu1 %v1234_v20  ;;  %1109 = vmatpush3.bf16.msra.mxu0 %v1235_v21 }
  0x96   : > { %1110 = vmatprep.subr.bf16.mxu0 %v1434_v3  ;;  %1124 = vmatprep.mubr.msk.bf16.mxu0 %vm1435_vm0, %v1434_v3 }
  0x97   : > { %1098 = vmatprep.mubr.msk.bf16.mxu1 %vm1435_vm0, %v1434_v3 }
  0x99   : > { %1111 = vmatpush3.bf16.msra.mxu0 %v1236_v22 }
  0x9a   : > { %1112 = vmatprep.subr.bf16.mxu0 %v1434_v3 }
  0x9d   : > { %1113 = vmatpush3.bf16.msra.mxu0 %v1237_v23 }
  0x9e   : > { %1114 = vmatprep.subr.bf16.mxu0 %v1434_v3 }
  0xa1   : > { %1115 = vmatpush3.bf16.msra.mxu0 %v1238_v24 }
  0xa2   : > { %1116 = vmatprep.subr.bf16.mxu0 %v1434_v3 }
  0xa5   : > { %1117 = vmatpush3.bf16.msra.mxu0 %v1239_v25 }
  0xa6   : > { %1118 = vmatprep.subr.bf16.mxu0 %v1434_v3 }
  0xa9   : > { %1119 = vmatpush3.bf16.msra.mxu0 %v1240_v26 }
  0xaa   : > { %1120 = vmatprep.subr.bf16.mxu0 %v1434_v3 }
  0xad   : > { %1121 = vmatpush3.bf16.msra.mxu0 %v1241_v27 }
  0xae   : > { %1122 = vmatprep.subr.bf16.mxu0 %v1434_v3 }
  0xb1   : > { %1123 = vmatpush3.bf16.msra.mxu0 %v1242_v28 }
  0xb4   : > { %1125 = vmatmul.mubr.bf16.vlgmr.msra.gmra.mxu0 %v1233_v19 }
 0x154   : > { %v387_v29 = vpop.f32.mrf.mxu0 }
 0x155   : > { %v505_v30 = vpop.f32.mrf.mxu1 }
 0x156   : > { %v1074_v31 = vpop.f32.mrf.mxu0 }
 0x157   : > { %v1094_v32 = vpop.f32.mrf.mxu1 }
 0x158   : > { %v390_v33 = vpop.f32.mrf.mxu0 }
 0x159   : > { %v508_v34 = vpop.f32.mrf.mxu1  ;;  %v396_v39 = vpack.c.bf16 %v390_v33, %v387_v29 }
 0x15a   : > { %v515_v35 = vpack.c.bf16 %v508_v34, %v505_v30  ;;  %v1075_v36 = vpop.f32.mrf.mxu0 }
 0x15b   : > { %v1095_v38 = vpop.f32.mrf.mxu1 }
 0x15c   : > { %1097 = vmatpush3.bf16.msra.mxu1 %v515_v35 }
 0x15d   : > { %1102 = vmatprep.subr.bf16.mxu1 %v1434_v3 }
 0x15f   : > { %1099 = vmatmul.mubr.msk.bf16.vlgmr.msra.gmra.mxu1 %vm521_vm1, %v1243_v37 }
 0x160   : > { %1103 = vmatpush3.bf16.msra.mxu1 %v396_v39  ;;  %1104 = vmatprep.mubr.msk.bf16.mxu1 %vm1435_vm0, %v1434_v3 }
 0x161   : > { %1128 = vmatprep.subr.bf16.mxu1 %v1434_v3 }
 0x167   : > { %1105 = vmatmul.mubr.msk.bf16.vlgmr.msra.gmra.mxu1 %vm521_vm1, %v1244_v40 }
 0x168   : > { %1130 = vmatprep.mubr.msk.bf16.mxu1 %vm1435_vm0, %v1434_v3 }
 0x174   : > { %v723_v41 = vpop.f32.mrf.mxu0 }
 0x176   : > { %v1126_v42 = vpop.f32.mrf.mxu0 }
 0x178   : > { %v726_v43 = vpop.f32.mrf.mxu0 }
 0x179   : > { %v733_v44 = vpack.c.bf16 %v726_v43, %v723_v41 }
 0x17a   : > { %v1127_v45 = vpop.f32.mrf.mxu0 }
 0x17b   : > { %1129 = vmatpush3.bf16.msra.mxu1 %v733_v44 }
 0x17e   : > { %1131 = vmatmul.mubr.msk.bf16.vlgmr.msra.gmra.mxu1 %vm521_vm1, %v1245_v46 }
 0x21f   : > { %v559_v47 = vpop.f32.mrf.mxu1 }
 0x221   : > { %v1100_v48 = vpop.f32.mrf.mxu1 }
 0x223   : > { %v562_v49 = vpop.f32.mrf.mxu1 }
 0x225   : > { %v1101_v50 = vpop.f32.mrf.mxu1 }
 0x227   : > { %v608_v51 = vpop.f32.mrf.mxu1 }
 0x228   : > { %v609_v52 = vadd.f32 %v608_v51, %v559_v47 }
 0x229   : > { %v1106_v54 = vpop.f32.mrf.mxu1 }
 0x22a   : > { %v622_v56 = vadd.f32 %v970_v53, %v609_v52 }
 0x22b   : > { %v611_v55 = vpop.f32.mrf.mxu1 }
 0x22c   : > { %v612_v57 = vadd.f32 %v611_v55, %v562_v49 }
 0x22d   : > { %v1107_v58 = vpop.f32.mrf.mxu1 }
 0x22e   : > { %v623_v59 = vadd.f32 %v970_v53, %v612_v57 }
 0x230   : > { %v1016_v60 = vpack.c.bf16 %v623_v59, %v622_v56 }
 0x232   : > { %1017 = vst [vmem:[#allocation2] sm:$0xff] %v1016_v60  }
 0x23e   : > { %v784_v61 = vpop.f32.mrf.mxu1 }
 0x23f   : > { %v785_v1 = vadd.f32 %v996_v62, %v784_v61 }
 0x240   : > { %v1132_v63 = vpop.f32.mrf.mxu1 }
 0x242   : > { %v787_v0 = vpop.f32.mrf.mxu1 }
 0x243   : > { %v788_v2 = vadd.f32 %v996_v62, %v787_v0  ;;  %814 = sbr.rel (%p1003_p10) target bundleno = 586 (0x24a), region = 60 }
 0x244   : > { %v1133_v3 = vpop.f32.mrf.mxu1 }
 0x245   : > { %v1021_v4 = vpack.c.bf16 %v788_v2, %v785_v1 }
 0x247   : > { %1022 = vst [vmem:[#allocation2 + $0x8] sm:$0xff] %v1021_v4  }
 0x248   : > { %815 = vst [vmem:[#allocation10] sm:$0xff] %v622_v56  ;;  %816 = vst [vmem:[#allocation10 + $0x8] sm:$0xff] %v623_v59 }
 0x249   : > { %818 = vst [vmem:[#allocation10 + $0x10] sm:$0xff] %v785_v1  ;;  %819 = vst [vmem:[#allocation10 + $0x18] sm:$0xff] %v788_v2 }
 0x24a PF: > { %p1172_p1 = scmp.eq.s32.totalorder %s1483_s19, 2  ;;  %s1436_s25 = smov [#allocation10]  }
 0x24b   : > { %s826_s30 = sshll.u32 %s1436_s25, 4  ;;  %s827_s30 = int_to_ptr.vmem [resolvable:$true] %s826_s30 }
 0x24c   : > { %s1354_s5 = scalar_lea.vmem %s827_s30, 512  ;;  %p1361_p4 = scmp.lt.s32.totalorder %s827_s30, %s827_s30 }
 0x24d   : > { %p1355_p6 = scmp.ne.s32.totalorder %s827_s30, %s1354_s5  ;;  %p1362_p9 = scmp.lt.s32.totalorder %s1354_s5, %s1354_s5 }
 0x24f   : > { %p1356_p7 = pnand %p1355_p6, %p1172_p1  ;;  %p1363_p5 = por %p1362_p9, %p1361_p4 }
 0x251   : > { %p1357_p11 = pneg %p1356_p7 }
 0x253   : > { %p1364_p2 = pnand %p1363_p5, %p1357_p11 }
 0x255   : > { %1367 = shalt.err (!%p1364_p2)
}
 0x256   : > { %s1437_s8 = smov 128   ;;  %s1438_s18 = smov 8  }
 0x257   : > { %1150 = dma.vmem_to_hbm [thread:$0]  (%p1172_p1), %s827_s30, 512, %s1759_s4, [#allocation5], %s1437_s8, %s1437_s8, %s1438_s18  }
 0x258   : > { %1407 = dma.done.wait (%p1172_p1), [#allocation5], 512  }
 0x259   : > { %1409 = vsyncadd (%p1172_p1), [#allocation5], 4294966784 }
 0x25a PF: > { %p14_p12 = scmp.ge.s32.totalorder %s1486_s20, 5   ;;  %s1777_s15 = smov %s1416_s16 }
 0x25b   : > { %s1778_s16 = smov %s1420_s17  ;;  %s1779_s17 = smov %s1496_s23 }
 0x25c   : > { %s1780_s18 = smov %s1486_s20  ;;  %16 = sbr.rel (!%p14_p12) target bundleno = 4 (0x4), region = 106 }
 0x261   :  { %842 = vsyncpa [#allocation4], 1 }
 0x262   :  { %844 = vsyncpa [#allocation4 + $0x1], 1 }
 0x263   :  { %845 = vsyncpa [#allocation7], 1 }
 0x264   :  { %846 = vsyncpa [#allocation5], 1 }
 0x265   :  { %848 = vsyncpa [#allocation5 + $0x1], 1 }

</bundles_post_ra>
